<compile_context>
chip_gen: v7x
topology: tpu7x:2x2x1
jax: 0.10.0
libtpu: 0.0.40
codegen_flags: <defaults>
</compile_context>

<pallas_src>
import functools
import math

import jax
import jax.numpy as jnp
from jax.experimental import pallas as pl
from jax.experimental.pallas import tpu as pltpu


_LOG_2PI = math.log(2.0 * math.pi)
_LOG_2 = math.log(2.0)


def _round_up(x, m):
    return ((x + m - 1) // m) * m


# --------------------------------------------------------------------------- #
# Kernel
# --------------------------------------------------------------------------- #
def _fused_policy_kernel(obs_ref, eps_ref,
                         w1_ref, b1_ref, w2_ref, b2_ref, w3_ref, b3_ref,
                         out_ref, *, act_dim):
    """One batch tile, transposed layout: batch on the 128-lane axis.

    Shapes inside the kernel (TB = batch tile, L = layer_size, A = act_dim):
      obs_ref : [obs_dim, TB]        eps_ref : [A, TB]
      w1_ref  : [2L, obs_dim]        b1_ref  : [2L, 1]
      w2_ref  : [2L, 2L]             b2_ref  : [2L, 1]
      w3_ref  : [2A, 2L]             b3_ref  : [2A, 1]
      out_ref : [2A + 1, TB] = rows [ pi_act | tanh(mean) | logp ]

    Weights are the host-packed fused (mu || log_std) MLP (block-diagonal),
    pre-transposed so heads rows are [mean ; log_std].
    """
    cdt = w1_ref.dtype            # matmul operand dtype (bf16 or f32)
    obs = obs_ref[...]
    eps = eps_ref[...]

    h = jnp.dot(w1_ref[...], obs.astype(cdt),
                preferred_element_type=jnp.float32) + b1_ref[...]
    h = jnp.maximum(h, 0.0)
    h = jnp.dot(w2_ref[...], h.astype(cdt),
                preferred_element_type=jnp.float32) + b2_ref[...]
    h = jnp.maximum(h, 0.0)
    heads = jnp.dot(w3_ref[...], h.astype(cdt),
                    preferred_element_type=jnp.float32) + b3_ref[...]

    mean = heads[:act_dim, :]
    log_std = heads[act_dim:, :]

    std = jnp.exp(log_std)
    pi_act = mean + std * eps                      # rsample(): mean + std * eps

    # Fused Normal(mean,std).log_prob(pi_act) - tanh-squash correction.
    # per-element: -0.5*eps^2 - log_std + 2*a + 2*softplus(-2a)      (a = pi_act)
    # The constant  act_dim * (-0.5*log(2*pi) - 2*log(2))  is hoisted out of the
    # vector expression and added once after the cross-sublane reduce.
    softplus = jnp.logaddexp(0.0, -2.0 * pi_act)
    logp_elem = -0.5 * eps * eps - log_std + 2.0 * pi_act + 2.0 * softplus
    logp_row = (jnp.sum(logp_elem, axis=0, keepdims=True)
                + act_dim * (-0.5 * _LOG_2PI - 2.0 * _LOG_2))

    # Lane-dense (full 128-lane) stores; the sublane split (A|A|1 rows) is cheap.
    # (A single concatenate would need 8-aligned sublane chunks for Mosaic, so
    # three row-sliced full-lane stores are used instead.)
    out_ref[:act_dim, :] = pi_act
    out_ref[act_dim:2 * act_dim, :] = jnp.tanh(mean)
    out_ref[2 * act_dim:, :] = logp_row


# --------------------------------------------------------------------------- #
# Host-side parameter packing (done ONCE, outside the kernel)
# --------------------------------------------------------------------------- #
def _block_diag(a, b):
    ra, ca = a.shape
    rb, cb = b.shape
    return jnp.concatenate([
        jnp.concatenate([a, jnp.zeros((ra, cb), a.dtype)], axis=1),
        jnp.concatenate([jnp.zeros((rb, ca), b.dtype), b], axis=1),
    ], axis=0)


def pack_policy_params(mu_params, log_params, param_dtype=jnp.bfloat16):
    """Fuse mu_network and log_network into one pre-transposed block-diag MLP.

    Each *_params is (w1, b1, w2, b2, w3, b3) with weights [in, out] and biases
    [1, out] (i.e. transposed vs torch.nn.Linear.weight).  Returned weights are
    [out_total, in_total] (kernel computes W @ x, batch on lanes) cast to
    `param_dtype` (bf16 by default); biases stay f32 (added to the f32 MXU
    accumulator)."""
    mw1, mb1, mw2, mb2, mw3, mb3 = mu_params
    lw1, lb1, lw2, lb2, lw3, lb3 = log_params
    W1 = jnp.concatenate([mw1.T, lw1.T], axis=0)        # [2L, obs_dim]
    B1 = jnp.concatenate([mb1, lb1], axis=1).T          # [2L, 1]
    W2 = _block_diag(mw2.T, lw2.T)                      # [2L, 2L]
    B2 = jnp.concatenate([mb2, lb2], axis=1).T          # [2L, 1]
    W3 = _block_diag(mw3.T, lw3.T)                      # [2A, 2L]
    B3 = jnp.concatenate([mb3, lb3], axis=1).T          # [2A, 1]
    return (W1.astype(param_dtype), B1.astype(jnp.float32),
            W2.astype(param_dtype), B2.astype(jnp.float32),
            W3.astype(param_dtype), B3.astype(jnp.float32))


# --------------------------------------------------------------------------- #
# Wrapper
# --------------------------------------------------------------------------- #
def _pick_batch_tile(B, block_batch):
    """Largest lane-aligned batch tile <= block_batch; once B exceeds one tile
    keep >=2 grid steps so both v7x TensorCores get work."""
    if B <= block_batch:
        return B                                   # one tile = whole batch
    tb = min(block_batch, _round_up((B + 1) // 2, 128))
    return max(128, (tb // 128) * 128)


def regaussian_policy_forward(obs, eps, packed_params, *, block_batch=2048):
    """obs: [B, obs_dim] f32, eps: [B, act_dim] f32 (standard normal noise).

    packed_params: output of pack_policy_params().
    Returns (pi_act [B, act_dim], logp_pi [B], tanh(mean) [B, act_dim])."""
    B, obs_dim = obs.shape
    act_dim = eps.shape[1]
    W1, B1, W2, B2, W3, B3 = packed_params
    out_rows = 2 * act_dim + 1

    # Transposed data layout: batch on the 128-lane (minor) axis.
    obs_t = obs.T                                   # [obs_dim, B]
    eps_t = eps.T                                   # [act_dim, B]

    TB = _pick_batch_tile(B, block_batch)
    grid = (pl.cdiv(B, TB),)

    def batch_spec(rows):
        # Blocked along the (lane) batch axis; pipelined by Pallas.
        return pl.BlockSpec((rows, TB), lambda i: (0, i))

    def resident_spec(arr):
        # Full-array block, constant index_map -> stays VMEM-resident.
        return pl.BlockSpec(arr.shape, lambda i: (0, 0))

    kernel = functools.partial(_fused_policy_kernel, act_dim=act_dim)

    out = pl.pallas_call(
        kernel,
        out_shape=jax.ShapeDtypeStruct((out_rows, B), jnp.float32),
        grid=grid,
        in_specs=[
            batch_spec(obs_dim),                    # obs (transposed)
            batch_spec(act_dim),                    # eps (transposed)
            resident_spec(W1), resident_spec(B1),
            resident_spec(W2), resident_spec(B2),
            resident_spec(W3), resident_spec(B3),
        ],
        out_specs=batch_spec(out_rows),
        compiler_params=pltpu.CompilerParams(
            dimension_semantics=("parallel",)),     # megacore sharding on v7x
    )(obs_t, eps_t, W1, B1, W2, B2, W3, B3)

    pi_act = out[:act_dim, :].T
    tanh_mean = out[act_dim:2 * act_dim, :].T
    logp_pi = out[2 * act_dim, :]
    return pi_act, logp_pi, tanh_mean


# --------------------------------------------------------------------------- #
# Param init + pure-JAX reference (for correctness check)
# --------------------------------------------------------------------------- #
def _init_mlp_params(key, input_dim, output_dim, layer_size):
    """Xavier-normal weights (as in MLP.init_weights), torch-default uniform biases."""
    dims = [(input_dim, layer_size), (layer_size, layer_size), (layer_size, output_dim)]
    params = []
    for (fan_in, fan_out) in dims:
        key, kw, kb = jax.random.split(key, 3)
        std = math.sqrt(2.0 / (fan_in + fan_out))
        w = std * jax.random.normal(kw, (fan_in, fan_out), dtype=jnp.float32)
        bound = 1.0 / math.sqrt(fan_in)
        b = jax.random.uniform(kb, (1, fan_out), jnp.float32, -bound, bound)
        params += [w, b]
    return tuple(params), key


def _reference_forward(obs, eps, mu_params, log_params):
    """Pure-JAX f32 reference matching the PyTorch module semantics."""
    def mlp(x, p):
        w1, b1, w2, b2, w3, b3 = p
        h = jnp.maximum(x @ w1 + b1, 0.0)
        h = jnp.maximum(h @ w2 + b2, 0.0)
        return h @ w3 + b3

    mean = mlp(obs, mu_params)
    log_std = mlp(obs, log_params)
    std = jnp.exp(log_std)
    pi_act = mean + std * eps
    logp = (-0.5 * ((pi_act - mean) / std) ** 2 - log_std
            - 0.5 * math.log(2 * math.pi)).sum(axis=-1)
    logp -= (2.0 * (math.log(2.0) - pi_act
                    - jax.nn.softplus(-2.0 * pi_act))).sum(axis=1)
    return pi_act, logp, jnp.tanh(mean)


if __name__ == "__main__":
    # Small synthetic shapes consistent with the module.
    # (For realistic SAC benchmarking use B >= 2048 and time with xprof.)
    batch, obs_dim, act_dim, layer_size = 8, 16, 4, 32

    key = jax.random.PRNGKey(0)
    key, k_obs, k_eps = jax.random.split(key, 3)
    obs = jax.random.normal(k_obs, (batch, obs_dim), dtype=jnp.float32)
    eps = jax.random.normal(k_eps, (batch, act_dim), dtype=jnp.float32)

    mu_params, key = _init_mlp_params(key, obs_dim, act_dim, layer_size)
    log_params, key = _init_mlp_params(key, obs_dim, act_dim, layer_size)

    ref_pi, ref_logp, ref_tanh = _reference_forward(obs, eps, mu_params, log_params)

    # 1) f32 packed weights: tight check of structure / layout / fusion.
    packed_f32 = pack_policy_params(mu_params, log_params, param_dtype=jnp.float32)
    pi32, logp32, tanh32 = jax.block_until_ready(
        regaussian_policy_forward(obs, eps, packed_f32))
    assert jnp.allclose(pi32, ref_pi, atol=5e-4, rtol=1e-4)
    assert jnp.allclose(tanh32, ref_tanh, atol=5e-4, rtol=1e-4)
    assert jnp.allclose(logp32, ref_logp, atol=2e-3, rtol=1e-3)

    # 2) bf16 packed weights (default / production path): looser check
    #    (bf16 MXU operands, f32 accumulation + f32 elementwise math).
    packed_bf16 = pack_policy_params(mu_params, log_params)
    pi16, logp16, tanh16 = jax.block_until_ready(
        regaussian_policy_forward(obs, eps, packed_bf16))
    assert jnp.allclose(pi16, ref_pi, atol=5e-2, rtol=5e-2)
    assert jnp.allclose(tanh16, ref_tanh, atol=5e-2, rtol=5e-2)
    assert jnp.allclose(logp16, ref_logp, atol=5e-1, rtol=5e-2)

    print("KERNEL_OK")
</pallas_src>

<mosaic_0001>
module attributes {stable_mosaic.version = 11 : i64} {
  func.func @_fused_policy_kernel(%arg0: i32, %arg1: memref<16x8xf32, #tpu.memory_space<vmem>>, %arg2: memref<4x8xf32, #tpu.memory_space<vmem>>, %arg3: memref<64x16xf32, #tpu.memory_space<vmem>>, %arg4: memref<64x1xf32, #tpu.memory_space<vmem>>, %arg5: memref<64x64xf32, #tpu.memory_space<vmem>>, %arg6: memref<64x1xf32, #tpu.memory_space<vmem>>, %arg7: memref<8x64xf32, #tpu.memory_space<vmem>>, %arg8: memref<8x1xf32, #tpu.memory_space<vmem>>, %arg9: memref<9x8xf32, #tpu.memory_space<vmem>>) attributes {dimension_semantics = [#tpu.dimension_semantics<parallel>], iteration_bounds = array<i64: 1>, scalar_prefetch = 0 : i64, scratch_operands = 0 : i64, tpu.core_type = #tpu.core_type<tc>, window_params = [{transform_indices = @transform_0, window_bounds = array<i64: 16, 8>}, {transform_indices = @transform_1, window_bounds = array<i64: 4, 8>}, {pipeline_mode = #tpu.pipeline_mode<synchronous>, transform_indices = @transform_2, window_bounds = array<i64: 64, 16>}, {pipeline_mode = #tpu.pipeline_mode<synchronous>, transform_indices = @transform_3, window_bounds = array<i64: 64, 1>}, {pipeline_mode = #tpu.pipeline_mode<synchronous>, transform_indices = @transform_4, window_bounds = array<i64: 64, 64>}, {pipeline_mode = #tpu.pipeline_mode<synchronous>, transform_indices = @transform_5, window_bounds = array<i64: 64, 1>}, {pipeline_mode = #tpu.pipeline_mode<synchronous>, transform_indices = @transform_6, window_bounds = array<i64: 8, 64>}, {pipeline_mode = #tpu.pipeline_mode<synchronous>, transform_indices = @transform_7, window_bounds = array<i64: 8, 1>}, {transform_indices = @transform_8, window_bounds = array<i64: 9, 8>}]} {
    %c0 = arith.constant 0 : index
    %c0_0 = arith.constant 0 : index
    %0 = vector.load %arg1[%c0, %c0_0] : memref<16x8xf32, #tpu.memory_space<vmem>>, vector<16x8xf32>
    %c0_1 = arith.constant 0 : index
    %c0_2 = arith.constant 0 : index
    %1 = vector.load %arg2[%c0_1, %c0_2] : memref<4x8xf32, #tpu.memory_space<vmem>>, vector<4x8xf32>
    %c0_3 = arith.constant 0 : index
    %c0_4 = arith.constant 0 : index
    %2 = vector.load %arg3[%c0_3, %c0_4] : memref<64x16xf32, #tpu.memory_space<vmem>>, vector<64x16xf32>
    %cst = arith.constant dense<0.000000e+00> : vector<64x8xf32>
    %3 = tpu.matmul %2, %0, %cst {dimension_numbers = #tpu.dot_dimension_numbers<[1], [0], [0], [1], [0, 0, 1, 1], [], []>} : vector<64x16xf32>, vector<16x8xf32>, vector<64x8xf32> -> vector<64x8xf32>
    %c0_5 = arith.constant 0 : index
    %c0_6 = arith.constant 0 : index
    %4 = vector.load %arg4[%c0_5, %c0_6] : memref<64x1xf32, #tpu.memory_space<vmem>>, vector<64x1xf32>
    %5 = vector.broadcast %4 : vector<64x1xf32> to vector<64x8xf32>
    %6 = arith.addf %3, %5 : vector<64x8xf32>
    %cst_7 = arith.constant 0.000000e+00 : f32
    %7 = vector.broadcast %cst_7 : f32 to vector<64x8xf32>
    %8 = arith.maximumf %6, %7 : vector<64x8xf32>
    %c0_8 = arith.constant 0 : index
    %c0_9 = arith.constant 0 : index
    %9 = vector.load %arg5[%c0_8, %c0_9] : memref<64x64xf32, #tpu.memory_space<vmem>>, vector<64x64xf32>
    %cst_10 = arith.constant dense<0.000000e+00> : vector<64x8xf32>
    %10 = tpu.matmul %9, %8, %cst_10 {dimension_numbers = #tpu.dot_dimension_numbers<[1], [0], [0], [1], [0, 0, 1, 1], [], []>} : vector<64x64xf32>, vector<64x8xf32>, vector<64x8xf32> -> vector<64x8xf32>
    %c0_11 = arith.constant 0 : index
    %c0_12 = arith.constant 0 : index
    %11 = vector.load %arg6[%c0_11, %c0_12] : memref<64x1xf32, #tpu.memory_space<vmem>>, vector<64x1xf32>
    %12 = vector.broadcast %11 : vector<64x1xf32> to vector<64x8xf32>
    %13 = arith.addf %10, %12 : vector<64x8xf32>
    %cst_13 = arith.constant 0.000000e+00 : f32
    %14 = vector.broadcast %cst_13 : f32 to vector<64x8xf32>
    %15 = arith.maximumf %13, %14 : vector<64x8xf32>
    %c0_14 = arith.constant 0 : index
    %c0_15 = arith.constant 0 : index
    %16 = vector.load %arg7[%c0_14, %c0_15] : memref<8x64xf32, #tpu.memory_space<vmem>>, vector<8x64xf32>
    %cst_16 = arith.constant dense<0.000000e+00> : vector<8x8xf32>
    %17 = tpu.matmul %16, %15, %cst_16 {dimension_numbers = #tpu.dot_dimension_numbers<[1], [0], [0], [1], [0, 0, 1, 1], [], []>} : vector<8x64xf32>, vector<64x8xf32>, vector<8x8xf32> -> vector<8x8xf32>
    %c0_17 = arith.constant 0 : index
    %c0_18 = arith.constant 0 : index
    %18 = vector.load %arg8[%c0_17, %c0_18] : memref<8x1xf32, #tpu.memory_space<vmem>>, vector<8x1xf32>
    %19 = vector.broadcast %18 : vector<8x1xf32> to vector<8x8xf32>
    %20 = arith.addf %17, %19 : vector<8x8xf32>
    %21 = vector.extract_strided_slice %20 {offsets = [0, 0], sizes = [4, 8], strides = [1, 1]} : vector<8x8xf32> to vector<4x8xf32>
    %22 = vector.extract_strided_slice %20 {offsets = [4, 0], sizes = [4, 8], strides = [1, 1]} : vector<8x8xf32> to vector<4x8xf32>
    %23 = math.exp %22 : vector<4x8xf32>
    %24 = arith.mulf %23, %1 : vector<4x8xf32>
    %25 = arith.addf %21, %24 : vector<4x8xf32>
    %cst_19 = arith.constant -2.000000e+00 : f32
    %26 = vector.broadcast %cst_19 : f32 to vector<4x8xf32>
    %27 = arith.mulf %26, %25 : vector<4x8xf32>
    %cst_20 = arith.constant 0.000000e+00 : f32
    %28 = vector.broadcast %cst_20 : f32 to vector<4x8xf32>
    %29 = arith.maximumf %28, %27 : vector<4x8xf32>
    %30 = vector.broadcast %cst_20 : f32 to vector<4x8xf32>
    %31 = arith.subf %30, %27 : vector<4x8xf32>
    %32 = arith.cmpf one, %31, %31 : vector<4x8xf32>
    %33 = vector.broadcast %cst_20 : f32 to vector<4x8xf32>
    %34 = arith.addf %33, %27 : vector<4x8xf32>
    %35 = math.absf %31 : vector<4x8xf32>
    %cst_21 = arith.constant 0.000000e+00 : f32
    %36 = vector.broadcast %cst_21 : f32 to vector<4x8xf32>
    %37 = arith.subf %36, %35 : vector<4x8xf32>
    %38 = math.exp %37 : vector<4x8xf32>
    %39 = math.log1p %38 : vector<4x8xf32>
    %40 = arith.addf %29, %39 : vector<4x8xf32>
    %41 = arith.select %32, %34, %40 : vector<4x8xi1>, vector<4x8xf32>
    %cst_22 = arith.constant -5.000000e-01 : f32
    %42 = vector.broadcast %cst_22 : f32 to vector<4x8xf32>
    %43 = arith.mulf %42, %1 : vector<4x8xf32>
    %44 = arith.mulf %43, %1 : vector<4x8xf32>
    %45 = arith.subf %44, %22 : vector<4x8xf32>
    %cst_23 = arith.constant 2.000000e+00 : f32
    %46 = vector.broadcast %cst_23 : f32 to vector<4x8xf32>
    %47 = arith.mulf %46, %25 : vector<4x8xf32>
    %48 = arith.addf %45, %47 : vector<4x8xf32>
    %cst_24 = arith.constant 2.000000e+00 : f32
    %49 = vector.broadcast %cst_24 : f32 to vector<4x8xf32>
    %50 = arith.mulf %49, %41 : vector<4x8xf32>
    %51 = arith.addf %48, %50 : vector<4x8xf32>
    %cst_25 = arith.constant dense<0.000000e+00> : vector<8xf32>
    %52 = vector.multi_reduction <add>, %51, %cst_25 [0] : vector<4x8xf32> to vector<8xf32>
    %53 = vector.shape_cast %52 : vector<8xf32> to vector<1x8xf32>
    %cst_26 = arith.constant -9.220932 : f32
    %54 = vector.broadcast %cst_26 : f32 to vector<1x8xf32>
    %55 = arith.addf %53, %54 : vector<1x8xf32>
    %c0_27 = arith.constant 0 : index
    %c0_28 = arith.constant 0 : index
    %56 = vector.load %arg9[%c0_27, %c0_28] : memref<9x8xf32, #tpu.memory_space<vmem>>, vector<4x8xf32>
    tpu.vector_store %arg9[%c0_27, %c0_28], %25 {strides = array<i32>} : memref<9x8xf32, #tpu.memory_space<vmem>>, vector<4x8xf32>,
    %57 = math.tanh %21 : vector<4x8xf32>
    %c4 = arith.constant 4 : index
    %c0_29 = arith.constant 0 : index
    %58 = vector.load %arg9[%c4, %c0_29] : memref<9x8xf32, #tpu.memory_space<vmem>>, vector<4x8xf32>
    tpu.vector_store %arg9[%c4, %c0_29], %57 {strides = array<i32>} : memref<9x8xf32, #tpu.memory_space<vmem>>, vector<4x8xf32>,
    %c8 = arith.constant 8 : index
    %c0_30 = arith.constant 0 : index
    %59 = vector.load %arg9[%c8, %c0_30] : memref<9x8xf32, #tpu.memory_space<vmem>>, vector<1x8xf32>
    tpu.vector_store %arg9[%c8, %c0_30], %55 {strides = array<i32>} : memref<9x8xf32, #tpu.memory_space<vmem>>, vector<1x8xf32>,
    return
  }
  func.func @transform_0(%arg0: i32) -> (i32, i32) {
    %c0_i32 = arith.constant 0 : i32
    %c0_i32_0 = arith.constant 0 : i32
    return %c0_i32, %arg0 : i32, i32
  }
  func.func @transform_1(%arg0: i32) -> (i32, i32) {
    %c0_i32 = arith.constant 0 : i32
    %c0_i32_0 = arith.constant 0 : i32
    return %c0_i32, %arg0 : i32, i32
  }
  func.func @transform_2(%arg0: i32) -> (i32, i32) {
    %c0_i32 = arith.constant 0 : i32
    %c0_i32_0 = arith.constant 0 : i32
    %c0_i32_1 = arith.constant 0 : i32
    return %c0_i32, %c0_i32_0 : i32, i32
  }
  func.func @transform_3(%arg0: i32) -> (i32, i32) {
    %c0_i32 = arith.constant 0 : i32
    %c0_i32_0 = arith.constant 0 : i32
    %c0_i32_1 = arith.constant 0 : i32
    return %c0_i32, %c0_i32_0 : i32, i32
  }
  func.func @transform_4(%arg0: i32) -> (i32, i32) {
    %c0_i32 = arith.constant 0 : i32
    %c0_i32_0 = arith.constant 0 : i32
    %c0_i32_1 = arith.constant 0 : i32
    return %c0_i32, %c0_i32_0 : i32, i32
  }
  func.func @transform_5(%arg0: i32) -> (i32, i32) {
    %c0_i32 = arith.constant 0 : i32
    %c0_i32_0 = arith.constant 0 : i32
    %c0_i32_1 = arith.constant 0 : i32
    return %c0_i32, %c0_i32_0 : i32, i32
  }
  func.func @transform_6(%arg0: i32) -> (i32, i32) {
    %c0_i32 = arith.constant 0 : i32
    %c0_i32_0 = arith.constant 0 : i32
    %c0_i32_1 = arith.constant 0 : i32
    return %c0_i32, %c0_i32_0 : i32, i32
  }
  func.func @transform_7(%arg0: i32) -> (i32, i32) {
    %c0_i32 = arith.constant 0 : i32
    %c0_i32_0 = arith.constant 0 : i32
    %c0_i32_1 = arith.constant 0 : i32
    return %c0_i32, %c0_i32_0 : i32, i32
  }
  func.func @transform_8(%arg0: i32) -> (i32, i32) {
    %c0_i32 = arith.constant 0 : i32
    %c0_i32_0 = arith.constant 0 : i32
    return %c0_i32, %arg0 : i32, i32
  }
}

</mosaic_0001>

<bundles_post_ra>
// kernel: tpu_custom_call.1
= control target key start
LH: loop header
LB: loop body
LE: loop exit
PB: predicated region body
PF: predicated region fallthrough
CT: control target
= control target key end

     0   :  { %vm88_vm0 = vcmask 130048   ;;  %v719_v3 = vmov 0   ;;  %vm282_vm1 = vcmask 523264   ;;  %vm721_vm2 = vmmov 0   ;;  %s908_s0 = inlined_call_operand.vmem [shape: f32[16,8], index: 0, kind: input, shape index: {}]   ;;  %s909_s2 = inlined_call_operand.vmem [shape: f32[64,16], index: 2, kind: input, shape index: {}]   ;;  %s910_s3 = inlined_call_operand.vmem [shape: f32[64,1], index: 3, kind: input, shape index: {}]   ;;  %s911_s5 = inlined_call_operand.vmem [shape: f32[64,1], index: 5, kind: input, shape index: {}]   ;;  %s912_s7 = inlined_call_operand.vmem [shape: f32[8,1], index: 7, kind: input, shape index: {}]   ;;  %s913_s4 = inlined_call_operand.vmem [shape: f32[64,64], index: 4, kind: input, shape index: {}]   ;;  %s914_s6 = inlined_call_operand.vmem [shape: f32[8,64], index: 6, kind: input, shape index: {}]   ;;  %s915_s1 = inlined_call_operand.vmem [shape: f32[4,8], index: 1, kind: input, shape index: {}]   ;;  %s916_s8 = inlined_call_operand.vmem [shape: f32[9,8], index: 8, kind: output, shape index: {}]  }
   0x1   :  { %v29_v0 = vld [vmem:[%s908_s0] sm:$0xff]  ;;  %v30_v1 = vld [vmem:[%s908_s0 + $0x8] sm:$0xff]  ;;  %709 = vset.pattern.permute.xlu0 %v719_v3  ;;  %710 = vset.pattern.permute.xlu1 %v719_v3  ;;  %v42_v7 = vld [vmem:[%s910_s3 + $0x10] sm:$0xff]  ;;  %vm540_vm3 = vcmask 60416   ;;  %vm552_vm6 = vcmask 57344  }
   0x2   :  { %v32_v2 = vld [vmem:[%s909_s2] sm:$0xff]  ;;  %v673_v4 = vpack.c.bf16 %v30_v1, %v29_v0  ;;  %v33_v6 = vld [vmem:[%s909_s2 + $0x8] sm:$0xff]  ;;  %v34_v8 = vld [vmem:[%s909_s2 + $0x10] sm:$0xff]  ;;  %60 = vperm.xlu1 %710, %v42_v7  }
   0x3   :  { %614 = vmatprep.mubr.msk.f32.mxu0 %vm88_vm0, %v32_v2  ;;  %v40_v5 = vld [vmem:[%s910_s3] sm:$0xff]  ;;  %v41_v9 = vld [vmem:[%s910_s3 + $0x8] sm:$0xff]  ;;  %v43_v10 = vld [vmem:[%s910_s3 + $0x18] sm:$0xff] }
   0x4   :  { %674 = vmatprep.subr.bf16.mxu0 %v673_v4  ;;  %50 = vperm.xlu0 %709, %v40_v5   ;;  %v35_v11 = vld [vmem:[%s909_s2 + $0x18] sm:$0xff]  ;;  %v36_v12 = vld [vmem:[%s909_s2 + $0x20] sm:$0xff]  ;;  %v45_v14 = vld [vmem:[%s910_s3 + $0x28] sm:$0xff] }
   0x5   :  { %676 = vmatpush3.bf16.msra.mxu0 %v673_v4  ;;  %v44_v13 = vld [vmem:[%s910_s3 + $0x20] sm:$0xff]  ;;  %v37_v15 = vld [vmem:[%s909_s2 + $0x28] sm:$0xff]  ;;  %v38_v16 = vld [vmem:[%s909_s2 + $0x30] sm:$0xff] }
   0x6   :  { %65 = vperm.xlu1 %710, %v43_v10   ;;  %v46_v17 = vld [vmem:[%s910_s3 + $0x30] sm:$0xff]  ;;  %v47_v18 = vld [vmem:[%s910_s3 + $0x38] sm:$0xff]  ;;  %v234_v20 = vld [vmem:[%s911_s5] sm:$0xff]  ;;  %v722_v10 = vmov 0.0  }
   0x7   :  { %v39_v19 = vld [vmem:[%s909_s2 + $0x38] sm:$0xff]  ;;  %v235_v21 = vld [vmem:[%s911_s5 + $0x8] sm:$0xff]  ;;  %v236_v22 = vld [vmem:[%s911_s5 + $0x10] sm:$0xff] }
   0x8   :  { %615 = vmatmul.mubr.msk.f32.vlgmr.msra.gmra.mrb[0].mxu0 %vm88_vm0, %v33_v6  ;;  %55 = vperm.xlu0 %709, %v41_v9   ;;  %v237_v23 = vld [vmem:[%s911_s5 + $0x18] sm:$0xff]  ;;  %v238_v24 = vld [vmem:[%s911_s5 + $0x20] sm:$0xff]  ;;  %v239_v25 = vld [vmem:[%s911_s5 + $0x28] sm:$0xff]  ;;  %v720_v9 = vmov 0.0|0.0  }
   0x9   :  { %617 = vmatprep.mubr.msk.f32.mxu0 %vm88_vm0, %v34_v8  ;;  %v240_v26 = vld [vmem:[%s911_s5 + $0x30] sm:$0xff]  ;;  %v241_v27 = vld [vmem:[%s911_s5 + $0x38] sm:$0xff]  ;;  %v421_v28 = vld [vmem:[%s912_s7] sm:$0xff]  ;;  %693 = vmatprep.subr.bf16.mxu0 %v720_v9 }
   0xa   :  { %75 = vperm.xlu1 %710, %v45_v14   ;;  %v226_v29 = vld [vmem:[%s913_s4] sm:$0xff]  ;;  %v227_v2 = vld [vmem:[%s913_s4 + $0x8] sm:$0xff]  ;;  %v228_v3 = vld [vmem:[%s913_s4 + $0x10] sm:$0xff] }
   0xb   :  { %642 = vmatprep.mubr.msk.f32.mxu1 %vm282_vm1, %v226_v29  ;;  %v229_v4 = vld [vmem:[%s913_s4 + $0x18] sm:$0xff]  ;;  %v230_v5 = vld [vmem:[%s913_s4 + $0x20] sm:$0xff]  ;;  %v231_v6 = vld [vmem:[%s913_s4 + $0x28] sm:$0xff] }
   0xc   :  { %618 = vmatmul.mubr.msk.f32.gmra.mrb[2].mxu0 %vm88_vm0, %v35_v11  ;;  %70 = vperm.xlu0 %709, %v44_v13   ;;  %v232_v7 = vld [vmem:[%s913_s4 + $0x30] sm:$0xff]  ;;  %v233_v8 = vld [vmem:[%s913_s4 + $0x38] sm:$0xff] }
   0xd   :  { %620 = vmatprep.mubr.msk.f32.mxu0 %vm88_vm0, %v36_v12 }
   0xe   :  { %85 = vperm.xlu1 %710, %v47_v18  }
  0x10   :  { %621 = vmatmul.mubr.msk.f32.gmra.mrb[4].mxu0 %vm88_vm0, %v37_v15  ;;  %80 = vperm.xlu0 %709, %v46_v17  }
  0x11   :  { %623 = vmatprep.mubr.msk.f32.mxu0 %vm88_vm0, %v38_v16 }
  0x12   :  { %249 = vperm.xlu1 %710, %v235_v21  }
  0x14   :  { %624 = vmatmul.mubr.msk.f32.gmra.mrb[6].mxu0 %vm88_vm0, %v39_v19  ;;  %244 = vperm.xlu0 %709, %v234_v20  }
  0x15   :  { %670 = vmatprep.mubr.msk.f32.mxu0 %vm721_vm2, %v722_v10 }
  0x16   :  { %259 = vperm.xlu1 %710, %v237_v23  }
  0x18   :  { %254 = vperm.xlu0 %709, %v236_v22  }
  0x1a   :  { %269 = vperm.xlu1 %710, %v239_v25  }
  0x1c   :  { %264 = vperm.xlu0 %709, %v238_v24  }
  0x1e   :  { %279 = vperm.xlu1 %710, %v241_v27  }
  0x20   :  { %274 = vperm.xlu0 %709, %v240_v26  }
  0x24   :  { %424 = vperm.xlu0 %709, %v421_v28  }
  0x81   :  { %v61_v31 = vpop.permute.xlu1 %60 }
  0x83   :  { %v51_v30 = vpop.permute.xlu0 %50 }
  0x85   :  { %v66_v33 = vpop.permute.xlu1 %65 }
  0x87   :  { %v56_v32 = vpop.permute.xlu0 %55 }
  0x89   :  { %v76_v43 = vpop.permute.xlu1 %75 }
  0x8b   :  { %v71_v46 = vpop.permute.xlu0 %70 }
  0x8d   :  { %v86_v55 = vpop.permute.xlu1 %85 }
  0x8f   :  { %v81_v58 = vpop.permute.xlu0 %80 }
  0x91   :  { %v250_v11 = vpop.permute.xlu1 %249 }
  0x93   :  { %v245_v12 = vpop.permute.xlu0 %244 }
  0x95   :  { %v260_v13 = vpop.permute.xlu1 %259 }
  0x97   :  { %v255_v15 = vpop.permute.xlu0 %254 }
  0x99   :  { %v270_v24 = vpop.permute.xlu1 %269 }
  0x9b   :  { %v265_v27 = vpop.permute.xlu0 %264 }
  0xdb   :  { %v616_v34 = vpop.f32.mrb[0].mxu0 }
  0xdc   :  { %v185_v35 = vadd.f32 %v616_v34, %v56_v32  ;;  %v179_v36 = vpop.f32.mrb[1].mxu0 }
  0xdd   :  { %v180_v37 = vadd.f32 %v179_v36, %v51_v30  ;;  %v280_v36 = vpop.permute.xlu1 %279 }
  0xde   :  { %v219_v38 = vmax.f32 %v185_v35, 0.0 }
  0xdf   :  { %v218_v39 = vmax.f32 %v180_v37, 0.0  ;;  %v619_v40 = vpop.f32.mrb[2].mxu0 }
  0xe0   :  { %v195_v41 = vadd.f32 %v619_v40, %v66_v33  ;;  %v189_v42 = vpop.f32.mrb[3].mxu0 }
  0xe1   :  { %v190_v44 = vadd.f32 %v189_v42, %v61_v31  ;;  %v677_v45 = vpack.c.bf16 %v219_v38, %v218_v39  ;;  %v275_v39 = vpop.permute.xlu0 %274 }
  0xe2   :  { %v221_v47 = vmax.f32 %v195_v41, 0.0 }
  0xe3   :  { %v220_v48 = vmax.f32 %v190_v44, 0.0  ;;  %v622_v49 = vpop.f32.mrb[4].mxu0  ;;  %678 = vmatprep.subr.bf16.mxu1 %v677_v45 }
  0xe4   :  { %v205_v50 = vadd.f32 %v622_v49, %v76_v43  ;;  %v199_v51 = vpop.f32.mrb[5].mxu0  ;;  %680 = vmatpush3.bf16.msra.mxu1 %v677_v45 }
  0xe5   :  { %v681_v52 = vpack.c.bf16 %v221_v47, %v220_v48  ;;  %v200_v53 = vadd.f32 %v199_v51, %v71_v46  ;;  %v420_v47 = vld [vmem:[%s914_s6] sm:$0xff]  ;;  %v425_v48 = vpop.permute.xlu0 %424 }
  0xe6   :  { %v223_v54 = vmax.f32 %v205_v50, 0.0 }
  0xe7   :  { %v222_v56 = vmax.f32 %v200_v53, 0.0  ;;  %v625_v57 = vpop.f32.mrb[6].mxu0  ;;  %682 = vmatprep.subr.bf16.mxu1 %v681_v52  ;;  %v31_v53 = vld [vmem:[%s915_s1] sm:$0xf] }
  0xe8   :  { %v215_v59 = vadd.f32 %v625_v57, %v86_v55  ;;  %v209_v60 = vpop.f32.mrb[7].mxu0  ;;  %684 = vmatpush3.bf16.msra.mxu1 %v681_v52 }
  0xe9   :  { %v685_v61 = vpack.c.bf16 %v223_v54, %v222_v56  ;;  %v210_v62 = vadd.f32 %v209_v60, %v81_v58  ;;  %v503_v54 = vrot.slane %v31_v53, 4 }
  0xea   :  { %v225_v63 = vmax.f32 %v215_v59, 0.0 }
  0xeb   :  { %v224_v0 = vmax.f32 %v210_v62, 0.0  ;;  %686 = vmatprep.subr.bf16.mxu1 %v685_v61 }
  0xec   :  { %688 = vmatpush3.bf16.msra.mxu1 %v685_v61 }
  0xed   :  { %v689_v1 = vpack.c.bf16 %v225_v63, %v224_v0 }
  0xef   :  { %690 = vmatprep.subr.bf16.mxu1 %v689_v1 }
  0xf0   :  { %692 = vmatpush3.bf16.msra.mxu1 %v689_v1 }
  0xf3   :  { %643 = vmatmul.mubr.msk.f32.vlgmr.msra.gmra.mrb[0].mxu1 %vm282_vm1, %v227_v2 }
  0xf4   :  { %645 = vmatprep.mubr.msk.f32.mxu1 %vm282_vm1, %v228_v3 }
  0xf7   :  { %646 = vmatmul.mubr.msk.f32.gmra.mrb[2].mxu1 %vm282_vm1, %v229_v4 }
  0xf8   :  { %648 = vmatprep.mubr.msk.f32.mxu1 %vm282_vm1, %v230_v5  ;;  %v530_v5 = vmul.f32 -0.5, %v31_v53 }
  0xfa   :  { %v531_v10 = vmul.f32 %v530_v5, %v31_v53 }
  0xfb   :  { %649 = vmatmul.mubr.msk.f32.gmra.mrb[4].mxu1 %vm282_vm1, %v231_v6 }
  0xfc   :  { %651 = vmatprep.mubr.msk.f32.mxu1 %vm282_vm1, %v232_v7 }
  0xff   :  { %652 = vmatmul.mubr.msk.f32.gmra.mrb[6].mxu1 %vm282_vm1, %v233_v8 }
 0x1c6   :  { %v644_v14 = vpop.f32.mrb[0].mxu1 }
 0x1c7   :  { %v379_v16 = vadd.f32 %v644_v14, %v250_v11  ;;  %v373_v17 = vpop.f32.mrb[1].mxu1 }
 0x1c8   :  { %v374_v18 = vadd.f32 %v373_v17, %v245_v12 }
 0x1c9   :  { %v413_v19 = vmax.f32 %v379_v16, 0.0 }
 0x1ca   :  { %v412_v20 = vmax.f32 %v374_v18, 0.0  ;;  %v647_v21 = vpop.f32.mrb[2].mxu1 }
 0x1cb   :  { %v389_v22 = vadd.f32 %v647_v21, %v260_v13  ;;  %v383_v23 = vpop.f32.mrb[3].mxu1 }
 0x1cc   :  { %v694_v25 = vpack.c.bf16 %v413_v19, %v412_v20  ;;  %v384_v26 = vadd.f32 %v383_v23, %v255_v15 }
 0x1cd   :  { %v415_v28 = vmax.f32 %v389_v22, 0.0 }
 0x1ce   :  { %v414_v29 = vmax.f32 %v384_v26, 0.0  ;;  %v650_v30 = vpop.f32.mrb[4].mxu1  ;;  %695 = vmatpush3.bf16.msra.mxu0 %v694_v25 }
 0x1cf   :  { %v399_v31 = vadd.f32 %v650_v30, %v270_v24  ;;  %v393_v32 = vpop.f32.mrb[5].mxu1  ;;  %696 = vmatprep.subr.bf16.mxu0 %v720_v9 }
 0x1d0   :  { %v697_v33 = vpack.c.bf16 %v415_v28, %v414_v29  ;;  %v394_v34 = vadd.f32 %v393_v32, %v265_v27 }
 0x1d1   :  { %v417_v35 = vmax.f32 %v399_v31, 0.0 }
 0x1d2   :  { %v416_v37 = vmax.f32 %v394_v34, 0.0  ;;  %v653_v38 = vpop.f32.mrb[6].mxu1  ;;  %698 = vmatpush3.bf16.msra.mxu0 %v697_v33 }
 0x1d3   :  { %v409_v40 = vadd.f32 %v653_v38, %v280_v36  ;;  %v403_v41 = vpop.f32.mrb[7].mxu1  ;;  %699 = vmatprep.subr.bf16.mxu0 %v720_v9 }
 0x1d4   :  { %v700_v42 = vpack.c.bf16 %v417_v35, %v416_v37  ;;  %v404_v43 = vadd.f32 %v403_v41, %v275_v39 }
 0x1d5   :  { %v419_v44 = vmax.f32 %v409_v40, 0.0 }
 0x1d6   :  { %v418_v45 = vmax.f32 %v404_v43, 0.0  ;;  %701 = vmatpush3.bf16.msra.mxu0 %v700_v42 }
 0x1d7   :  { %702 = vmatprep.subr.bf16.mxu0 %v720_v9 }
 0x1d8   :  { %v703_v46 = vpack.c.bf16 %v419_v44, %v418_v45 }
 0x1da   :  { %704 = vmatpush3.bf16.msra.mxu0 %v703_v46 }
 0x1dd   :  { %671 = vmatmul.mubr.msk.f32.vlgmr.msra.gmra.mrb[8].mxu0 %vm282_vm1, %v420_v47 }
 0x2b0   :  { %v496_v49 = vpop.f32.mrb[8].mxu0 }
 0x2b1   :  { %v497_v50 = vadd.f32 %v496_v49, %v425_v48  ;;  %v672_v51 = vpop.f32.mrb[9].mxu0 }
 0x2b3   :  { %v500_v52 = vmul.f32 1.442695, %v497_v50  ;;  %711 = vtanh.f32 %v497_v50  ;;  %v533_v11 = vrot.slane %v497_v50, 4 }
 0x2b5   :  { %713 = vpow2.f32 %v500_v52  ;;  %v535_v16 = vsub.f32 %v531_v10, %v533_v11 }
 0x2bd   :  { %v712_v55 = vpop.eup %711 }
 0x2be   :  { %551 = vst.msk [vmem:[%s916_s8 + $0x4] sm:$0xf] %vm540_vm3, %v712_v55 }
 0x2bf   :  { %v714_v56 = vpop.eup %713 }
 0x2c0   :  { %v505_v57 = vmul.f32 %v714_v56, %v503_v54 }
 0x2c2   :  { %v507_v58 = vrot.slane %v505_v57, 4 }
 0x2c4   :  { %v509_v59 = vadd.f32 %v507_v58, %v497_v50 }
 0x2c6   :  { %v510_v60 = vmul.f32 -2.0, %v509_v59  ;;  %549 = vst.msk [vmem:[%s916_s8] sm:$0xf] %vm540_vm3, %v509_v59  ;;  %v536_v14 = vmul.f32 2.0, %v509_v59 }
 0x2c8   :  { %v512_v61 = vsub.f32 0.0, %v510_v60  ;;  %v511_v12 = vmax.f32 %v510_v60, 0.0  ;;  %v537_v18 = vadd.f32 %v536_v14, %v535_v16 }
 0x2ca   :  { %v515_v62 = vand.u32 2147483647, %v512_v61  ;;  %vm513_vm5 = vcmp.ne.f32.partialorder %v512_v61, %v512_v61 }
 0x2cc   :  { %v516_v63 = vsub.f32 0.0, %v515_v62 }
 0x2ce   :  { %v517_v0 = vmul.f32 1.442695, %v516_v63 }
 0x2d0   :  { %715 = vpow2.f32 %v517_v0 }
 0x2da   :  { %v716_v1 = vpop.eup %715 }
 0x2db   :  { %v519_v2 = vadd.f32 1.0, %v716_v1  ;;  %v522_v3 = vmul.f32 -0.5, %v716_v1  ;;  %v525_v6 = vand.u32 2147483647, %v716_v1 }
 0x2dd   :  { %717 = vlog2.f32 %v519_v2  ;;  %v523_v4 = vadd.f32 1.0, %v522_v3  ;;  %vm526_vm4 = vcmp.lt.f32.partialorder %v525_v6, 0.0004427343 }
 0x2df   :  { %v524_v9 = vmul.f32 %v716_v1, %v523_v4 }
 0x2e7   :  { %v718_v7 = vpop.eup %717 }
 0x2e8   :  { %v521_v8 = vmul.f32 0.6931472, %v718_v7 }
 0x2ea   :  { %v527_v13 = vsel %vm526_vm4, %v524_v9, %v521_v8 }
 0x2eb   :  { %v528_v15 = vadd.f32 %v527_v13, %v511_v12 }
 0x2ed   :  { %v529_v17 = vsel %vm513_vm5, %v510_v60, %v528_v15 }
 0x2ee   :  { %v538_v19 = vmul.f32 2.0, %v529_v17 }
 0x2f0   :  { %v539_v20 = vadd.f32 %v538_v19, %v537_v18 }
 0x2f2   :  { %v541_v21 = vsel %vm540_vm3, %v539_v20, 0.0 }
 0x2f3   :  { %v542_v22 = vrot.slane %v541_v21, 4 }
 0x2f5   :  { %v543_v23 = vadd.f32 %v542_v22, %v541_v21 }
 0x2f7   :  { %v544_v24 = vrot.slane %v543_v23, 2 }
 0x2f9   :  { %v545_v25 = vadd.f32 %v544_v24, %v543_v23 }
 0x2fb   :  { %v546_v26 = vrot.slane %v545_v25, 1 }
 0x2fd   :  { %v547_v27 = vadd.f32 %v546_v26, %v545_v25 }
 0x2ff   :  { %v548_v28 = vadd.f32 -9.220932, %v547_v27 }
 0x301   :  { %553 = vst.msk [vmem:[%s916_s8 + $0x8] sm:$0x1] %vm552_vm6, %v548_v28 }

</bundles_post_ra>
